<compile_context>
chip_gen: v6e
topology: v6e:2x2x1
jax: 0.10.0
libtpu: 0.0.40
codegen_flags: <defaults>
</compile_context>

<pallas_src>
import functools

import jax
import jax.numpy as jnp
from jax import lax
from jax.experimental import pallas as pl
from jax.experimental.pallas import tpu as pltpu


_DEFAULT_BLOCK_BYTES = 4 * 1024 * 1024     # ~4 MiB of input per grid step
_VMEM_LIMIT_BYTES = 32 * 1024 * 1024       # explicit scoped-VMEM budget


def _round_up(x: int, m: int) -> int:
    return ((x + m - 1) // m) * m


def _round_down(x: int, m: int) -> int:
    return (x // m) * m


def _rbl_block_kernel(x_ref, out_ref, *, lb, ub, n_valid_rows, chunk_rows,
                      need_row_mask, unroll):
    """One grid step: reduce a (tb, C) block to a single partial sum.

    The block is consumed in (chunk_rows, C) chunks; the running sum is an
    (8, C) f32 strip carried in vregs (no VMEM accumulator RMW).  The single
    cross-lane reduce + lane-dense (8, 128) store happen once per block.
    """
    tb, tn = x_ref.shape
    fold = chunk_rows // 8
    i = pl.program_id(0)

    if need_row_mask:
        # Number of rows of this block that hold real data (>= tb for
        # interior blocks, < tb only for the ragged last block).
        valid_rows = n_valid_rows - i * tb

    def body(c, carry):
        r = pl.multiple_of(c * chunk_rows, chunk_rows)
        x = x_ref[pl.ds(r, chunk_rows), :].astype(jnp.float32)
        pen = jnp.maximum(x - ub, 0.0) + jnp.maximum(lb - x, 0.0)
        if need_row_mask:
            rows = lax.broadcasted_iota(jnp.int32, (chunk_rows, tn), 0) + r
            # where() (select) is safe even if out-of-bounds garbage is NaN/inf.
            pen = jnp.where(rows < valid_rows, pen, 0.0)
        if fold > 1:
            # Sublane-tile-aligned fold (f32 layout): pure VALU adds, no XLU.
            pen = pen.reshape(fold, 8, tn).sum(axis=0)
        return carry + pen

    strip = lax.fori_loop(0, tb // chunk_rows, body,
                          jnp.zeros((8, tn), jnp.float32), unroll=unroll)

    # One cross-lane reduce per block (amortized over ~4 MiB of input), then a
    # full-tile unmasked lane-dense store.
    out_ref[...] = jnp.full(out_ref.shape, jnp.sum(strip), dtype=out_ref.dtype)


def range_bound_loss(y_pred, lb=0.9, ub=1.1, scale_factor=1.0,
                     y_obs=None, n_samples=None, *,
                     block_bytes=_DEFAULT_BLOCK_BYTES):
    """Pallas equivalent of RangeBoundLoss.forward; returns a scalar (f32).

    y_obs / n_samples are accepted for signature parity but unused (same as
    the PyTorch module).  y_pred may be float32 or bfloat16; accumulation is
    always float32.
    """
    del y_obs, n_samples
    if y_pred.ndim != 2:
        raise ValueError("range_bound_loss expects a 2-D y_pred (batch, samples)")
    B, N = y_pred.shape
    T = B * N
    lb = float(lb)
    ub = float(ub)
    # loss_factor and the 1/N of mean(dim=1) folded into one final scale.
    out_scale = float(scale_factor) / float(N)

    itemsize = jnp.dtype(y_pred.dtype).itemsize
    sub = max(8, 32 // itemsize)          # sublane packing: 8 f32 / 16 bf16
    chunk_rows = sub

    # Copy-free working view: lane-dense slab when the element count allows a
    # free reshape, otherwise the original (B, N) with full-width row blocks.
    work = None
    for lanes in (512, 256, 128):
        if T % lanes == 0:
            work = y_pred.reshape(T // lanes, lanes)
            break
    if work is None:
        # TODO(synk): for T % 128 != 0 combined with extremely wide rows
        # (N * itemsize >~ 8 MiB) the single full-width row block may exceed
        # the VMEM budget; such shapes would need in-kernel column tiling.
        work = y_pred
    R, C = work.shape

    row_bytes = _round_up(C, 128) * itemsize
    max_rows = max(chunk_rows,
                   _round_down(block_bytes // row_bytes, chunk_rows))
    tb = min(max_rows, _round_up(R, chunk_rows))
    gb = pl.cdiv(R, tb)
    need_row_mask = (gb * tb) != R

    trip = tb // chunk_rows
    if trip <= 8:
        unroll = True
    elif trip % 8 == 0:
        unroll = 8
    elif trip % 4 == 0:
        unroll = 4
    else:
        unroll = 2 if trip % 2 == 0 else 1

    kernel = functools.partial(
        _rbl_block_kernel, lb=lb, ub=ub, n_valid_rows=R,
        chunk_rows=chunk_rows, need_row_mask=need_row_mask, unroll=unroll)

    cost = pl.CostEstimate(
        flops=5 * T,
        transcendentals=0,
        bytes_accessed=T * itemsize + gb * 8 * 128 * 4,
    )

    partial_tiles = pl.pallas_call(
        kernel,
        out_shape=jax.ShapeDtypeStruct((gb * 8, 128), jnp.float32),
        grid_spec=pltpu.PrefetchScalarGridSpec(
            num_scalar_prefetch=0,
            grid=(gb,),
            in_specs=[pl.BlockSpec((tb, C), lambda i: (i, 0))],
            out_specs=pl.BlockSpec((8, 128), lambda i: (i, 0)),
        ),
        compiler_params=pltpu.CompilerParams(
            dimension_semantics=("parallel",),
            vmem_limit_bytes=_VMEM_LIMIT_BYTES),
        cost_estimate=cost,
    )(work)

    # One (8,128) tile per block, every element equal to that block's partial.
    return jnp.sum(partial_tiles[0::8, 0]) * out_scale


def range_bound_loss_ref(y_pred, lb=0.9, ub=1.1, scale_factor=1.0):
    """Pure-JAX reference mirroring the PyTorch forward (f32 math)."""
    y = y_pred.astype(jnp.float32)
    upper = jnp.maximum(y - ub, 0.0)
    lower = jnp.maximum(lb - y, 0.0)
    loss = scale_factor * (upper + lower)
    return jnp.sum(jnp.mean(loss, axis=1))


if __name__ == "__main__":
    lb, ub, loss_factor = 0.9, 1.1, 1.0
    k1, k2, k3, k4, k5 = jax.random.split(jax.random.PRNGKey(0), 5)

    # 1) Small case (module defaults): single block, lane-dense slab view,
    #    ragged rows masked in-kernel.
    y1 = jax.random.uniform(k1, (2, 256), jnp.float32, minval=0.5, maxval=1.5)
    out1 = jax.block_until_ready(range_bound_loss(y1, lb, ub, loss_factor))
    ref1 = range_bound_loss_ref(y1, lb, ub, loss_factor)
    assert jnp.allclose(out1, ref1, rtol=1e-5, atol=1e-6), (out1, ref1)

    # 2) Non-lane-divisible element count: direct (B, N) tiling, full-width
    #    rows, row mask -- no padded copy.
    y2 = jax.random.uniform(k2, (3, 1000), jnp.float32, minval=0.0, maxval=2.0)
    out2 = jax.block_until_ready(range_bound_loss(y2, lb, ub, loss_factor))
    ref2 = range_bound_loss_ref(y2, lb, ub, loss_factor)
    assert jnp.allclose(out2, ref2, rtol=1e-5, atol=1e-6), (out2, ref2)

    # 3) Multi-block streaming path (block size forced small to exercise the
    #    parallel grid + per-block partials at a small shape).
    y3 = jax.random.uniform(k3, (64, 4096), jnp.float32, minval=0.5, maxval=1.5)
    out3 = jax.block_until_ready(
        range_bound_loss(y3, lb, ub, 2.5, block_bytes=128 * 1024))
    ref3 = range_bound_loss_ref(y3, lb, ub, 2.5)
    assert jnp.allclose(out3, ref3, rtol=1e-4, atol=1e-6), (out3, ref3)

    # 4) Multi-block + ragged last row-block (mask on the streaming path).
    y4 = jax.random.uniform(k4, (100, 512), jnp.float32, minval=0.0, maxval=2.0)
    out4 = jax.block_until_ready(
        range_bound_loss(y4, lb, ub, loss_factor, block_bytes=64 * 1024))
    ref4 = range_bound_loss_ref(y4, lb, ub, loss_factor)
    assert jnp.allclose(out4, ref4, rtol=1e-4, atol=1e-6), (out4, ref4)

    # 5) bf16 input (halves HBM bytes); f32 accumulation inside the kernel.
    y5 = jax.random.uniform(k5, (4, 4096), jnp.float32, minval=0.5,
                            maxval=1.5).astype(jnp.bfloat16)
    out5 = jax.block_until_ready(range_bound_loss(y5, lb, ub, loss_factor))
    ref5 = range_bound_loss_ref(y5, lb, ub, loss_factor)
    assert jnp.allclose(out5, ref5, rtol=1e-4, atol=1e-6), (out5, ref5)

    print("KERNEL_OK")
</pallas_src>

<mosaic_0001>
module attributes {stable_mosaic.version = 11 : i64} {
  func.func @_rbl_block_kernel(%arg0: i32, %arg1: memref<8x512xf32, #tpu.memory_space<vmem>>, %arg2: memref<8x128xf32, #tpu.memory_space<vmem>>) attributes {dimension_semantics = [#tpu.dimension_semantics<parallel>], iteration_bounds = array<i64: 1>, scalar_prefetch = 0 : i64, scratch_operands = 0 : i64, tpu.core_type = #tpu.core_type<tc>, window_params = [{transform_indices = @transform_0, window_bounds = array<i64: 8, 512>}, {transform_indices = @transform_1, window_bounds = array<i64: 8, 128>}]} {
    %c8_i32 = arith.constant 8 : i32
    %0 = arith.muli %arg0, %c8_i32 : i32
    %c1_i32 = arith.constant 1 : i32
    %1 = arith.subi %c1_i32, %0 : i32
    %cst = arith.constant 0.000000e+00 : f32
    %2 = vector.broadcast %cst : f32 to vector<8x512xf32>
    %c0_i32 = arith.constant 0 : i32
    %c8_i32_0 = arith.constant 8 : i32
    %3 = arith.muli %c0_i32, %c8_i32_0 : i32
    %4 = tpu.assume_multiple %3, 8 : i32
    %5 = arith.index_cast %4 : i32 to index
    %c0 = arith.constant 0 : index
    %6 = vector.load %arg1[%5, %c0] : memref<8x512xf32, #tpu.memory_space<vmem>>, vector<8x512xf32>
    %cst_1 = arith.constant 1.100000e+00 : f32
    %7 = vector.broadcast %cst_1 : f32 to vector<8x512xf32>
    %8 = arith.subf %6, %7 : vector<8x512xf32>
    %cst_2 = arith.constant 0.000000e+00 : f32
    %9 = vector.broadcast %cst_2 : f32 to vector<8x512xf32>
    %10 = arith.maximumf %8, %9 : vector<8x512xf32>
    %cst_3 = arith.constant 0.899999976 : f32
    %11 = vector.broadcast %cst_3 : f32 to vector<8x512xf32>
    %12 = arith.subf %11, %6 : vector<8x512xf32>
    %cst_4 = arith.constant 0.000000e+00 : f32
    %13 = vector.broadcast %cst_4 : f32 to vector<8x512xf32>
    %14 = arith.maximumf %12, %13 : vector<8x512xf32>
    %15 = arith.addf %10, %14 : vector<8x512xf32>
    %16 = tpu.iota {dimensions = array<i32: 0>} : vector<8x512xi32>
    %17 = vector.broadcast %4 : i32 to vector<8x512xi32>
    %18 = arith.addi %16, %17 : vector<8x512xi32>
    %19 = vector.broadcast %1 : i32 to vector<8x512xi32>
    %20 = arith.cmpi slt, %18, %19 : vector<8x512xi32>
    %cst_5 = arith.constant 0.000000e+00 : f32
    %21 = vector.broadcast %cst_5 : f32 to vector<8x512xf32>
    %22 = arith.select %20, %15, %21 : vector<8x512xi1>, vector<8x512xf32>
    %23 = arith.addf %2, %22 : vector<8x512xf32>
    %c1_i32_6 = arith.constant 1 : i32
    %24 = vector.shape_cast %23 : vector<8x512xf32> to vector<1x8x512xf32>
    %cst_7 = arith.constant dense<0.000000e+00> : vector<1xf32>
    %25 = vector.multi_reduction <add>, %24, %cst_7 [1, 2] : vector<1x8x512xf32> to vector<1xf32>
    %26 = vector.shape_cast %25 : vector<1xf32> to vector<1x1x1xf32>
    %27 = vector.extract %26[0, 0, 0] : f32 from vector<1x1x1xf32>
    %28 = vector.broadcast %27 : f32 to vector<8x128xf32>
    %c0_8 = arith.constant 0 : index
    %c0_9 = arith.constant 0 : index
    %29 = vector.load %arg2[%c0_8, %c0_9] : memref<8x128xf32, #tpu.memory_space<vmem>>, vector<8x128xf32>
    tpu.vector_store %arg2[%c0_8, %c0_9], %28 {strides = array<i32>} : memref<8x128xf32, #tpu.memory_space<vmem>>, vector<8x128xf32>,
    return
  }
  func.func @transform_0(%arg0: i32) -> (i32, i32) {
    %c0_i32 = arith.constant 0 : i32
    %c0_i32_0 = arith.constant 0 : i32
    return %arg0, %c0_i32 : i32, i32
  }
  func.func @transform_1(%arg0: i32) -> (i32, i32) {
    %c0_i32 = arith.constant 0 : i32
    %c0_i32_0 = arith.constant 0 : i32
    return %arg0, %c0_i32 : i32, i32
  }
}

</mosaic_0001>

<bundles_post_ra>
// kernel: tpu_custom_call.1
= control target key start
LH: loop header
LB: loop body
LE: loop exit
PB: predicated region body
PF: predicated region fallthrough
CT: control target
= control target key end

     0   :  { %6 = vsyncpa [#allocation3], 0  ;;  %s282_s0 = inlined_call_operand.hbm [shape: f32[1,512], index: 0, kind: input, shape index: {}]   ;;  %s283_s1 = inlined_call_operand.hbm [shape: f32[8,128], index: 1, kind: output, shape index: {}]  }
   0x1   :  { %7 = vsyncpa [#allocation4], 0 }
   0x2   :  { %12 = vsyncadd [#allocation3], 448  ;;  %s257_s6 = smov [#allocation2]  }
   0x3   :  { %s13_s7 = sshll.u32 %s257_s6, 4  ;;  %s14_s7 = int_to_ptr.vmem [resolvable:$true] %s13_s7 }
   0x4   :  { %s221_s8 = scalar_lea.vmem %s14_s7, 64  ;;  %s225_s9 = scalar_lea.vmem %s14_s7, 512 }
   0x5   :  { %p222_p0 = scmp.ne.s32.totalorder %s14_s7, %s221_s8  ;;  %p226_p1 = scmp.lt.s32.totalorder %s14_s7, %s14_s7 }
   0x6   :  { %p227_p2 = scmp.lt.s32.totalorder %s225_s9, %s221_s8 }
   0x8   :  { %p228_p3 = por %p227_p2, %p226_p1 }
   0xa   :  { %p229_p4 = pnand %p228_p3, %p222_p0 }
   0xc   :  { %232 = shalt.err (!%p229_p4)
}
   0xd   :  { %s258_s10 = smov 64   ;;  %s259_s11 = smov 4  }
   0xe   :  { %19 = dma.hbm_to_vmem [thread:$0]  %s282_s0, 64, %s14_s7, [#allocation3], %s258_s10, %s258_s10, %s259_s11  }
   0xf   :  { %253 = dma.done.wait [#allocation3], 512  }
  0x10   :  { %254 = vsyncadd [#allocation3], 4294966784  ;;  %v75_v0 = vlaneseq  ;;  %v27_v2 = vld [vmem:[#allocation2] sm:$0xf]  ;;  %v28_v3 = vld [vmem:[#allocation2 + $0x4] sm:$0xf] }
  0x11   :  { %v29_v4 = vld [vmem:[#allocation2 + $0x8] sm:$0xf]  ;;  %v30_v5 = vld [vmem:[#allocation2 + $0xc] sm:$0xf]  ;;  %v31_v6 = vld [vmem:[#allocation2 + $0x10] sm:$0xf] }
  0x12   :  { %v275_v1 = vshrl.u32 %v75_v0, 7  ;;  %v32_v7 = vld [vmem:[#allocation2 + $0x14] sm:$0xf]  ;;  %v260_v8 = vmov 1966171168   ;;  %s261_s0 = smov [#allocation5]  }
  0x13   :  { %v94_v9 = vunpack.c.l.s4 %v260_v8  ;;  %v33_v10 = vld [vmem:[#allocation2 + $0x18] sm:$0xf]  ;;  %v34_v11 = vld [vmem:[#allocation2 + $0x1c] sm:$0xf]  ;;  %v198_v12 = vadd.f32 -1.1, %v27_v2 }
  0x14   :  { %v199_v13 = vadd.f32 -1.1, %v28_v3  ;;  %v200_v14 = vadd.f32 -1.1, %v29_v4  ;;  %v201_v15 = vadd.f32 -1.1, %v30_v5 }
  0x15   :  { %v202_v16 = vadd.f32 -1.1, %v31_v6  ;;  %v203_v17 = vadd.f32 -1.1, %v32_v7  ;;  %v204_v18 = vadd.f32 -1.1, %v33_v10  ;;  %v95_v22 = vunpack.c.0.s8 %v94_v9 }
  0x16   :  { %v205_v19 = vadd.f32 -1.1, %v34_v11  ;;  %v43_v20 = vmax.f32 %v198_v12, 0.0  ;;  %v44_v21 = vmax.f32 %v199_v13, 0.0  ;;  %v45_v23 = vmax.f32 %v200_v14, 0.0  ;;  %s189_s14 = sshll.u32 %s261_s0, 4  ;;  %s190_s14 = int_to_ptr.vmem [resolvable:$true] %s189_s14 }
  0x17   :  { %v46_v24 = vmax.f32 %v201_v15, 0.0  ;;  %v47_v25 = vmax.f32 %v202_v16, 0.0  ;;  %v48_v26 = vmax.f32 %v203_v17, 0.0  ;;  %v49_v27 = vmax.f32 %v204_v18, 0.0  ;;  %s233_s16 = scalar_lea.vmem %s190_s14, 128  ;;  %p238_p6 = scmp.lt.s32.totalorder %s190_s14, %s190_s14 }
  0x18   :  { %v50_v28 = vmax.f32 %v205_v19, 0.0  ;;  %v51_v29 = vsub.f32 0.9, %v27_v2  ;;  %v52_v30 = vsub.f32 0.9, %v28_v3  ;;  %v98_v37 = vsub.s32 %v95_v22, %v275_v1  ;;  %p234_p5 = scmp.ne.s32.totalorder %s190_s14, %s233_s16  ;;  %p239_p7 = scmp.lt.s32.totalorder %s233_s16, %s233_s16 }
  0x19   :  { %v53_v31 = vsub.f32 0.9, %v29_v4  ;;  %v54_v32 = vsub.f32 0.9, %v30_v5  ;;  %v55_v33 = vsub.f32 0.9, %v31_v6 }
  0x1a   :  { %v56_v34 = vsub.f32 0.9, %v32_v7  ;;  %v57_v35 = vsub.f32 0.9, %v33_v10  ;;  %v58_v36 = vsub.f32 0.9, %v34_v11  ;;  %p240_p8 = por %p239_p7, %p238_p6 }
  0x1b   :  { %v59_v38 = vmax.f32 %v51_v29, 0.0  ;;  %v60_v39 = vmax.f32 %v52_v30, 0.0  ;;  %v61_v40 = vmax.f32 %v53_v31, 0.0  ;;  %v62_v41 = vmax.f32 %v54_v32, 0.0 }
  0x1c   :  { %v63_v42 = vmax.f32 %v55_v33, 0.0  ;;  %v64_v43 = vmax.f32 %v56_v34, 0.0  ;;  %v65_v44 = vmax.f32 %v57_v35, 0.0  ;;  %v66_v45 = vmax.f32 %v58_v36, 0.0  ;;  %p241_p9 = pnand %p240_p8, %p234_p5 }
  0x1d   :  { %v67_v46 = vadd.f32 %v59_v38, %v43_v20  ;;  %v68_v47 = vadd.f32 %v60_v39, %v44_v21  ;;  %v69_v48 = vadd.f32 %v61_v40, %v45_v23  ;;  %v70_v49 = vadd.f32 %v62_v41, %v46_v24 }
  0x1e   :  { %v71_v50 = vadd.f32 %v63_v42, %v47_v25  ;;  %v72_v51 = vadd.f32 %v64_v43, %v48_v26  ;;  %v73_v52 = vadd.f32 %v65_v44, %v49_v27  ;;  %v74_v53 = vadd.f32 %v66_v45, %v50_v28 }
  0x1f   :  { %v89_v54 = vcombine.low %v67_v46, %v68_v47  ;;  %v90_v55 = vcombine.low %v69_v48, %v70_v49  ;;  %vm80_vm0 = vcmp.lt.s32.totalorder %v275_v1, 1 }
  0x20   :  { %v91_v56 = vcombine.low %v71_v50, %v72_v51  ;;  %v92_v57 = vcombine.low %v73_v52, %v74_v53 }
  0x21   :  { %v99_v58 = vrot.slane %v89_v54, %v98_v37  ;;  %v106_v59 = vrot.slane %v90_v55, %v98_v37 }
  0x22   :  { %v113_v60 = vrot.slane %v91_v56, %v98_v37  ;;  %v120_v61 = vrot.slane %v92_v57, %v98_v37 }
  0x23   :  { %v121_v62 = vcombine.low %v99_v58, %v106_v59  ;;  %v122_v63 = vcombine.high %v99_v58, %v106_v59 }
  0x24   :  { %v123_v0 = vcombine.low %v113_v60, %v120_v61  ;;  %v124_v2 = vcombine.high %v113_v60, %v120_v61 }
  0x25   :  { %v131_v3 = vrot.slane %v121_v62, %v98_v37  ;;  %v138_v4 = vrot.slane %v122_v63, %v98_v37 }
  0x26   :  { %v145_v5 = vrot.slane %v123_v0, %v98_v37  ;;  %v152_v6 = vrot.slane %v124_v2, %v98_v37 }
  0x28   :  { %v153_v7 = vcombine.low %v131_v3, %v145_v5  ;;  %v154_v8 = vcombine.high %v131_v3, %v145_v5  ;;  %v155_v9 = vcombine.low %v138_v4, %v152_v6  ;;  %v156_v10 = vcombine.high %v138_v4, %v152_v6 }
  0x2a   :  { %v161_v11 = vsel %vm80_vm0, %v153_v7, 0.0  ;;  %v162_v12 = vsel %vm80_vm0, %v155_v9, 0.0  ;;  %v163_v13 = vsel %vm80_vm0, %v154_v8, 0.0  ;;  %v164_v15 = vsel %vm80_vm0, %v156_v10, 0.0 }
  0x2b   :  { %v169_v14 = vadd.f32 %v162_v12, %v161_v11 }
  0x2d   :  { %v170_v16 = vadd.f32 %v169_v14, %v163_v13 }
  0x2f   :  { %v171_v17 = vadd.f32 %v170_v16, %v164_v15 }
  0x31   :  { %172 = vadd.xlane.f32.xlu0 %v171_v17 }
  0xba   :  { %v173_v18 = vpop.xlane.xlu0 %172 }
  0xbb   :  { %v174_v19 = vrot.slane %v173_v18, 4 }
  0xbd   :  { %v175_v20 = vadd.f32 %v174_v19, %v173_v18 }
  0xbf   :  { %v176_v21 = vrot.slane %v175_v20, 2 }
  0xc1   :  { %v177_v22 = vadd.f32 %v176_v21, %v175_v20 }
  0xc3   :  { %v178_v23 = vrot.slane %v177_v22, 1 }
  0xc5   :  { %v179_v24 = vadd.f32 %v178_v23, %v177_v22 }
  0xc7   :  { %206 = vpush %v179_v24 }
  0xf8   :  { %s207_s15 = spop %206 }
  0xf9   :  { %v181_v1 = vstv %s207_s15 }
  0xfa   :  { %182 = vst [vmem:[#allocation5] sm:$0xff] %v181_v1 }
  0xfb   :  { %244 = shalt.err (!%p241_p9)
}
  0xfc   :  { %192 = dma.vmem_to_hbm [thread:$0]  %s190_s14, 128, %s283_s1, [#allocation4]  }
  0xfd   :  { %255 = dma.done.wait [#allocation4], 128  }
  0xfe   :  { %256 = vsyncadd [#allocation4], 4294967168 }
  0xff   :  { %196 = vsyncpa [#allocation3], 1 }
 0x100   :  { %197 = vsyncpa [#allocation4], 1 }

</bundles_post_ra>
